<compile_context>
chip_gen: v7x
topology: tpu7x:2x2x1
jax: 0.10.0
libtpu: 0.0.40
codegen_flags: <defaults>
</compile_context>

<pallas_src>
import functools
import math

import jax
import jax.numpy as jnp
from jax.experimental import pallas as pl
from jax.experimental.pallas import tpu as pltpu

LANE = 128
SUBLANE = 8
HIDDEN = 256                 # classifier hidden width: nn.Linear(n_features, 256)
MAX_BATCH_TILE = 256
MAX_K_TILE = 2048
VMEM_BUDGET = 20 * 1024 * 1024   # keep the working set comfortably inside v5e/v7x budgets


def _round_up(x, m):
    return (x + m - 1) // m * m


def _cdiv(a, b):
    return -(-a // b)


def _siamese_kernel(x_ref, wbk_ref, wcls_ref, b_ref, out_ref, acc_ref, *,
                    f_pad, c_pad, compact):
    """One (batch-tile, K-tile) grid step.

    x_ref    : (2, bt, tk)            both towers, compute dtype
    wbk_ref  : (tk, wb_cols)          backbone weight K-slab, compute dtype
    wcls_ref : (f_pad+HIDDEN, cols)   packed classifier weights, compute dtype
    b_ref    : (8, b_cols)            packed biases (f32): row0 backbone, row1 b1, row2 b2
    out_ref  : (bt, c_pad + f_pad)    [logits | features] slab, f32
    acc_ref  : (2*bt, wb_cols)        f32 backbone accumulator (scratch)
    """
    bt = x_ref.shape[1]
    tk = x_ref.shape[2]
    wb_cols = wbk_ref.shape[1]
    k = pl.program_id(1)

    @pl.when(k == 0)
    def _init():
        acc_ref[...] = jnp.zeros_like(acc_ref)

    # Both towers through ONE MXU matmul.  (2, bt, tk) -> (2*bt, tk) is a free view
    # (no sublane/lane tile crossing), not a VMEM copy.
    x = x_ref[...].reshape(2 * bt, tk)
    acc_ref[...] += jnp.dot(x, wbk_ref[...], preferred_element_type=jnp.float32)

    @pl.when(k == pl.num_programs(1) - 1)
    def _finalize():
        cd = wcls_ref.dtype
        bb = b_ref[0:1, 0:wb_cols]
        b1 = b_ref[1:2, 0:HIDDEN]
        b2 = b_ref[2:3, 0:c_pad]
        w1 = wcls_ref[0:f_pad, 0:HIDDEN]
        w2 = wcls_ref[f_pad:f_pad + HIDDEN, 0:c_pad]

        # Synthetic backbone nonlinearity + Siamese elementwise product (f32).
        h = jnp.tanh(acc_ref[...] + bb)          # (2*bt, wb_cols)
        prod = h[:bt] * h[bt:]                   # (bt, wb_cols); sublane-aligned split

        if compact:
            # cnn|attn packed in ONE 128-lane group.  The 0.2/0.8 fusion weights are
            # folded into w1's rows, so the classifier consumes the raw products
            # directly (no cross-lane shuffle); the wrapper finishes the tiny
            # (B, n_features) weighted feature sum.
            feat_slab = prod
            cls_in = prod
        else:
            # cnn / attn halves start on 128-lane boundaries -> free views.
            feat_slab = 0.2 * prod[:, :f_pad] + 0.8 * prod[:, f_pad:]
            cls_in = feat_slab

        # Classifier: Linear(n_features, 256) -> ReLU -> Linear(256, num_classes).
        hid = jnp.maximum(
            jnp.dot(cls_in.astype(cd), w1, preferred_element_type=jnp.float32) + b1, 0.0)
        logits = jnp.dot(hid.astype(cd), w2, preferred_element_type=jnp.float32) + b2

        # Two lane-aligned, unmasked stores (no output concat temporary).
        out_ref[:, 0:c_pad] = logits.astype(out_ref.dtype)
        out_ref[:, c_pad:] = feat_slab.astype(out_ref.dtype)


@functools.partial(jax.jit,
                   static_argnames=("num_classes", "n_features", "compute_dtype"))
def siamese_forward(input1, input2, params, *, num_classes, n_features,
                    compute_dtype=jnp.bfloat16):
    B = input1.shape[0]
    in_dim = math.prod(input1.shape[1:])
    dt = jnp.dtype(compute_dtype)

    compact = 2 * n_features <= LANE
    f_pad = _round_up(n_features, LANE)
    wb_cols = LANE if compact else 2 * f_pad
    c_pad = _round_up(num_classes, LANE)
    cls_cols = max(HIDDEN, c_pad)
    b_cols = max(wb_cols, HIDDEN, c_pad)
    in_dim_p = _round_up(in_dim, LANE)

    # ---- tile selection: >=2 parallel batch tiles when possible (v7x megacore),
    #      adaptive tile so pad waste stays <= 7 rows/tile, K-tiles bound VMEM. ----
    bp0 = _round_up(B, SUBLANE)
    n_btiles = max(2 if bp0 >= 2 * SUBLANE else 1, _cdiv(bp0, MAX_BATCH_TILE))
    bt = _round_up(_cdiv(bp0, n_btiles), SUBLANE)
    tk = min(in_dim_p, MAX_K_TILE)

    def footprint(bt_, tk_):
        x_b = 2 * bt_ * tk_ * dt.itemsize * 2                          # double-buffered
        wbk_b = tk_ * wb_cols * dt.itemsize * (1 if tk_ >= in_dim_p else 2)
        wcls_b = (f_pad + HIDDEN) * cls_cols * dt.itemsize              # Buffered(1)
        bias_b = SUBLANE * b_cols * 4                                   # Buffered(1)
        out_b = bt_ * (c_pad + f_pad) * 4 * 2
        acc_b = 2 * bt_ * wb_cols * 4
        return x_b + wbk_b + wcls_b + bias_b + out_b + acc_b

    while footprint(bt, tk) > VMEM_BUDGET and tk > 4 * LANE:
        tk = max(4 * LANE, _round_up(tk // 2, LANE))
    while footprint(bt, tk) > VMEM_BUDGET and bt > SUBLANE:
        bt = max(SUBLANE, _round_up(bt // 2, SUBLANE))

    grid_b = _cdiv(bp0, bt)
    bp = grid_b * bt
    k_tiles = _cdiv(in_dim_p, tk)
    in_dim_kp = k_tiles * tk

    # ---- inputs: stack both towers; pad only if actually needed (no full
    #      scatter-into-zeros copy). ----
    x = jnp.stack([input1.reshape(B, in_dim), input2.reshape(B, in_dim)], axis=0)
    if bp != B or in_dim_kp != in_dim:
        x = jnp.pad(x, ((0, 0), (0, bp - B), (0, in_dim_kp - in_dim)))
    x = x.astype(compute_dtype)

    # ---- parameter packing.  Zero padding is load-bearing: padded backbone columns
    #      and bias lanes keep padded feature lanes at 0, and padded w1 rows keep the
    #      logits exact. ----
    wb = params["wb"].astype(jnp.float32)
    wbk = jnp.zeros((in_dim_kp, wb_cols), jnp.float32)
    if compact:
        wbk = wbk.at[:in_dim, :2 * n_features].set(wb)
    else:
        wbk = wbk.at[:in_dim, :n_features].set(wb[:, :n_features])
        wbk = wbk.at[:in_dim, f_pad:f_pad + n_features].set(wb[:, n_features:])
    wbk = wbk.astype(compute_dtype)

    w1 = params["w1"].astype(jnp.float32)
    w2 = params["w2"].astype(jnp.float32)
    wcls = jnp.zeros((f_pad + HIDDEN, cls_cols), jnp.float32)
    if compact:
        # Fold the 0.2 / 0.8 fusion weights into w1's rows (cnn rows, attn rows).
        wcls = wcls.at[:n_features, :HIDDEN].set(0.2 * w1)
        wcls = wcls.at[n_features:2 * n_features, :HIDDEN].set(0.8 * w1)
    else:
        wcls = wcls.at[:n_features, :HIDDEN].set(w1)
    wcls = wcls.at[f_pad:f_pad + HIDDEN, :num_classes].set(w2)
    wcls = wcls.astype(compute_dtype)

    bpack = jnp.zeros((SUBLANE, b_cols), jnp.float32)
    if compact:
        bpack = bpack.at[0, :2 * n_features].set(params["bb"][0])
    else:
        bpack = bpack.at[0, :n_features].set(params["bb"][0, :n_features])
        bpack = bpack.at[0, f_pad:f_pad + n_features].set(params["bb"][0, n_features:])
    bpack = bpack.at[1, :HIDDEN].set(params["b1"][0])
    bpack = bpack.at[2, :num_classes].set(params["b2"][0])

    kernel = functools.partial(_siamese_kernel, f_pad=f_pad, c_pad=c_pad,
                               compact=compact)

    # Backbone weight slab: single-buffer it when it is fully resident (one K tile),
    # double-buffer (default) when it streams over K.
    if k_tiles == 1:
        wbk_spec = pl.BlockSpec((tk, wb_cols), lambda i, k: (k, 0),
                                pipeline_mode=pl.Buffered(1))
    else:
        wbk_spec = pl.BlockSpec((tk, wb_cols), lambda i, k: (k, 0))

    flops = (2 * (2 * bp) * in_dim_kp * wb_cols        # backbone matmul (both towers)
             + 2 * bp * f_pad * HIDDEN                 # classifier layer 1
             + 2 * bp * HIDDEN * c_pad                 # classifier layer 2
             + 6 * bp * wb_cols)                       # fusion elementwise (approx)
    bytes_accessed = (x.size * dt.itemsize
                      + wbk.size * dt.itemsize * grid_b
                      + wcls.size * dt.itemsize
                      + bpack.size * 4
                      + bp * (c_pad + f_pad) * 4)
    cost = pl.CostEstimate(flops=flops,
                           transcendentals=2 * bp * wb_cols,
                           bytes_accessed=bytes_accessed)

    vmem_limit = int(min(max(2 * footprint(bt, tk) + (2 << 20), 16 << 20), 48 << 20))

    slab = pl.pallas_call(
        kernel,
        out_shape=jax.ShapeDtypeStruct((bp, c_pad + f_pad), jnp.float32),
        grid_spec=pltpu.PrefetchScalarGridSpec(
            num_scalar_prefetch=0,
            grid=(grid_b, k_tiles),
            in_specs=[
                pl.BlockSpec((2, bt, tk), lambda i, k: (0, i, k)),
                wbk_spec,
                pl.BlockSpec((f_pad + HIDDEN, cls_cols), lambda i, k: (0, 0),
                             pipeline_mode=pl.Buffered(1)),
                pl.BlockSpec((SUBLANE, b_cols), lambda i, k: (0, 0),
                             pipeline_mode=pl.Buffered(1)),
            ],
            out_specs=pl.BlockSpec((bt, c_pad + f_pad), lambda i, k: (i, 0)),
            scratch_shapes=[pltpu.VMEM((2 * bt, wb_cols), jnp.float32)],
        ),
        compiler_params=pltpu.CompilerParams(
            dimension_semantics=("parallel", "arbitrary"),
            vmem_limit_bytes=vmem_limit),
        cost_estimate=cost,
    )(x, wbk, wcls, bpack)

    logits = slab[:B, :num_classes]
    if compact:
        # Slab carries the raw cnn|attn products; finish the tiny fusion here.
        prod = slab[:B, c_pad:c_pad + 2 * n_features]
        features = 0.2 * prod[:, :n_features] + 0.8 * prod[:, n_features:]
    else:
        features = slab[:B, c_pad:c_pad + n_features]
    return logits, features


def _xavier_uniform(key, fan_in, fan_out, dtype=jnp.float32):
    limit = jnp.sqrt(6.0 / (fan_in + fan_out)).astype(dtype)
    return jax.random.uniform(key, (fan_in, fan_out), dtype, -limit, limit)


def make_params(key, in_dim, n_features, num_classes):
    kb, k1, k2 = jax.random.split(key, 3)
    # Synthetic backbone projection -> 2*n_features channels (cnn | attn halves).
    wb = _xavier_uniform(kb, in_dim, 2 * n_features)
    bb = jnp.full((1, 2 * n_features), 0.01, jnp.float32)
    # Classifier (matches the module init: xavier_uniform + bias 0.01).
    w1 = _xavier_uniform(k1, n_features, HIDDEN)
    b1 = jnp.full((1, HIDDEN), 0.01, jnp.float32)
    w2 = _xavier_uniform(k2, HIDDEN, num_classes)
    b2 = jnp.full((1, num_classes), 0.01, jnp.float32)
    return {"wb": wb, "bb": bb, "w1": w1, "b1": b1, "w2": w2, "b2": b2}


def _reference_forward(input1, input2, params, n_features):
    """Pure-JAX reference for correctness checking."""
    B = input1.shape[0]
    x1 = input1.reshape(B, -1)
    x2 = input2.reshape(B, -1)
    h1 = jnp.tanh(x1 @ params["wb"] + params["bb"])
    h2 = jnp.tanh(x2 @ params["wb"] + params["bb"])
    c1, a1 = h1[:, :n_features], h1[:, n_features:]
    c2, a2 = h2[:, :n_features], h2[:, n_features:]
    features = 0.2 * (c1 * c2) + 0.8 * (a1 * a2)
    hid = jnp.maximum(features @ params["w1"] + params["b1"], 0.0)
    out = hid @ params["w2"] + params["b2"]
    return out, features


if __name__ == "__main__":
    B, C, H, W = 2, 1, 16, 16          # NCHW, matching the module's 1-channel input
    n_features = 32
    num_classes = 16

    key = jax.random.PRNGKey(0)
    k_in1, k_in2, k_params = jax.random.split(key, 3)
    input1 = jax.random.normal(k_in1, (B, C, H, W), jnp.float32)
    input2 = jax.random.normal(k_in2, (B, C, H, W), jnp.float32)
    params = make_params(k_params, C * H * W, n_features, num_classes)

    ref_out, ref_feat = _reference_forward(input1, input2, params, n_features)

    # Default path: bf16 MXU operands (inputs/weights quantized to bf16 before the
    # backbone matmul), f32 accumulation -> loose tolerance.
    out_bf, feat_bf = siamese_forward(
        input1, input2, params, num_classes=num_classes, n_features=n_features)
    jax.block_until_ready((out_bf, feat_bf))
    assert out_bf.shape == (B, num_classes) and feat_bf.shape == (B, n_features)
    assert jnp.allclose(out_bf, ref_out, atol=5e-2, rtol=5e-2)
    assert jnp.allclose(feat_bf, ref_feat, atol=5e-2, rtol=5e-2)

    # f32 path (compact layout, single batch tile).  Tolerance covers the TPU default
    # matmul precision (bf16 passes) used by the pure-JAX reference.
    out_f32, feat_f32 = siamese_forward(
        input1, input2, params, num_classes=num_classes, n_features=n_features,
        compute_dtype=jnp.float32)
    jax.block_until_ready((out_f32, feat_f32))
    assert jnp.allclose(out_f32, ref_out, atol=1e-2, rtol=1e-2)
    assert jnp.allclose(feat_f32, ref_feat, atol=1e-2, rtol=1e-2)

    # Non-compact layout + multi-batch-tile path (grid_b = 2), f32.
    B2, n_features2 = 20, 72
    k3, k4, kp2 = jax.random.split(jax.random.PRNGKey(1), 3)
    input1b = jax.random.normal(k3, (B2, C, H, W), jnp.float32)
    input2b = jax.random.normal(k4, (B2, C, H, W), jnp.float32)
    params2 = make_params(kp2, C * H * W, n_features2, num_classes)
    ref_out2, ref_feat2 = _reference_forward(input1b, input2b, params2, n_features2)
    out2, feat2 = siamese_forward(
        input1b, input2b, params2, num_classes=num_classes, n_features=n_features2,
        compute_dtype=jnp.float32)
    jax.block_until_ready((out2, feat2))
    assert out2.shape == (B2, num_classes) and feat2.shape == (B2, n_features2)
    assert jnp.allclose(out2, ref_out2, atol=1e-2, rtol=1e-2)
    assert jnp.allclose(feat2, ref_feat2, atol=1e-2, rtol=1e-2)

    print("KERNEL_OK")
</pallas_src>

<mosaic_0001>
module attributes {stable_mosaic.version = 11 : i64} {
  func.func @_siamese_kernel(%arg0: i32, %arg1: i32, %arg2: memref<2x8x256xbf16, #tpu.memory_space<vmem>>, %arg3: memref<256x128xbf16, #tpu.memory_space<vmem>>, %arg4: memref<384x256xbf16, #tpu.memory_space<vmem>>, %arg5: memref<8x256xf32, #tpu.memory_space<vmem>>, %arg6: memref<8x256xf32, #tpu.memory_space<vmem>>, %arg7: memref<16x128xf32, #tpu.memory_space<vmem>>) attributes {dimension_semantics = [#tpu.dimension_semantics<parallel>, #tpu.dimension_semantics<arbitrary>], iteration_bounds = array<i64: 1, 1>, scalar_prefetch = 0 : i64, scratch_operands = 1 : i64, tpu.core_type = #tpu.core_type<tc>, window_params = [{transform_indices = @transform_0, window_bounds = array<i64: 2, 8, 256>}, {pipeline_mode = #tpu.pipeline_mode<synchronous>, transform_indices = @transform_1, window_bounds = array<i64: 256, 128>}, {pipeline_mode = #tpu.pipeline_mode<synchronous>, transform_indices = @transform_2, window_bounds = array<i64: 384, 256>}, {pipeline_mode = #tpu.pipeline_mode<synchronous>, transform_indices = @transform_3, window_bounds = array<i64: 8, 256>}, {transform_indices = @transform_4, window_bounds = array<i64: 8, 256>}]} {
    %c0_i32 = arith.constant 0 : i32
    %0 = arith.cmpi eq, %arg1, %c0_i32 : i32
    %1 = arith.extui %0 : i1 to i32
    %c0_i32_0 = arith.constant 0 : i32
    %2 = arith.cmpi ne, %1, %c0_i32_0 : i32
    scf.if %2 {
      %cst_11 = arith.constant 0.000000e+00 : f32
      %13 = vector.broadcast %cst_11 : f32 to vector<16x128xf32>
      %c0_12 = arith.constant 0 : index
      %c0_13 = arith.constant 0 : index
      %14 = vector.load %arg7[%c0_12, %c0_13] : memref<16x128xf32, #tpu.memory_space<vmem>>, vector<16x128xf32>
      tpu.vector_store %arg7[%c0_12, %c0_13], %13 {strides = array<i32>} : memref<16x128xf32, #tpu.memory_space<vmem>>, vector<16x128xf32>,
    } else {
    }
    %c0 = arith.constant 0 : index
    %c0_1 = arith.constant 0 : index
    %c0_2 = arith.constant 0 : index
    %3 = vector.load %arg2[%c0, %c0_1, %c0_2] : memref<2x8x256xbf16, #tpu.memory_space<vmem>>, vector<2x8x256xbf16>
    %4 = vector.shape_cast %3 : vector<2x8x256xbf16> to vector<16x256xbf16>
    %c0_3 = arith.constant 0 : index
    %c0_4 = arith.constant 0 : index
    %5 = vector.load %arg7[%c0_3, %c0_4] : memref<16x128xf32, #tpu.memory_space<vmem>>, vector<16x128xf32>
    %c0_5 = arith.constant 0 : index
    %c0_6 = arith.constant 0 : index
    %6 = vector.load %arg3[%c0_5, %c0_6] : memref<256x128xbf16, #tpu.memory_space<vmem>>, vector<256x128xbf16>
    %cst = arith.constant dense<0.000000e+00> : vector<16x128xf32>
    %7 = tpu.matmul %4, %6, %cst {dimension_numbers = #tpu.dot_dimension_numbers<[1], [0], [0], [1], [0, 0, 1, 1], [], []>} : vector<16x256xbf16>, vector<256x128xbf16>, vector<16x128xf32> -> vector<16x128xf32>
    %8 = arith.addf %5, %7 : vector<16x128xf32>
    %c0_7 = arith.constant 0 : index
    %c0_8 = arith.constant 0 : index
    %9 = vector.load %arg7[%c0_7, %c0_8] : memref<16x128xf32, #tpu.memory_space<vmem>>, vector<16x128xf32>
    tpu.vector_store %arg7[%c0_7, %c0_8], %8 {strides = array<i32>} : memref<16x128xf32, #tpu.memory_space<vmem>>, vector<16x128xf32>,
    %c0_i32_9 = arith.constant 0 : i32
    %10 = arith.cmpi eq, %arg1, %c0_i32_9 : i32
    %11 = arith.extui %10 : i1 to i32
    %c0_i32_10 = arith.constant 0 : i32
    %12 = arith.cmpi ne, %11, %c0_i32_10 : i32
    scf.if %12 {
      %c0_11 = arith.constant 0 : index
      %c0_12 = arith.constant 0 : index
      %13 = vector.load %arg5[%c0_11, %c0_12] : memref<8x256xf32, #tpu.memory_space<vmem>>, vector<1x128xf32>
      %c1 = arith.constant 1 : index
      %c0_13 = arith.constant 0 : index
      %14 = vector.load %arg5[%c1, %c0_13] : memref<8x256xf32, #tpu.memory_space<vmem>>, vector<1x256xf32>
      %c2 = arith.constant 2 : index
      %c0_14 = arith.constant 0 : index
      %15 = vector.load %arg5[%c2, %c0_14] : memref<8x256xf32, #tpu.memory_space<vmem>>, vector<1x128xf32>
      %c0_15 = arith.constant 0 : index
      %c0_16 = arith.constant 0 : index
      %16 = vector.load %arg4[%c0_15, %c0_16] : memref<384x256xbf16, #tpu.memory_space<vmem>>, vector<128x256xbf16>
      %c128 = arith.constant 128 : index
      %c0_17 = arith.constant 0 : index
      %17 = vector.load %arg4[%c128, %c0_17] : memref<384x256xbf16, #tpu.memory_space<vmem>>, vector<256x128xbf16>
      %c0_18 = arith.constant 0 : index
      %c0_19 = arith.constant 0 : index
      %18 = vector.load %arg7[%c0_18, %c0_19] : memref<16x128xf32, #tpu.memory_space<vmem>>, vector<16x128xf32>
      %19 = vector.broadcast %13 : vector<1x128xf32> to vector<16x128xf32>
      %20 = arith.addf %18, %19 : vector<16x128xf32>
      %21 = math.tanh %20 : vector<16x128xf32>
      %22 = vector.extract_strided_slice %21 {offsets = [0, 0], sizes = [8, 128], strides = [1, 1]} : vector<16x128xf32> to vector<8x128xf32>
      %23 = vector.extract_strided_slice %21 {offsets = [8, 0], sizes = [8, 128], strides = [1, 1]} : vector<16x128xf32> to vector<8x128xf32>
      %24 = arith.mulf %22, %23 : vector<8x128xf32>
      %25 = arith.truncf %24 : vector<8x128xf32> to vector<8x128xbf16>
      %cst_20 = arith.constant dense<0.000000e+00> : vector<8x256xf32>
      %26 = tpu.matmul %25, %16, %cst_20 {dimension_numbers = #tpu.dot_dimension_numbers<[1], [0], [0], [1], [0, 0, 1, 1], [], []>} : vector<8x128xbf16>, vector<128x256xbf16>, vector<8x256xf32> -> vector<8x256xf32>
      %27 = vector.broadcast %14 : vector<1x256xf32> to vector<8x256xf32>
      %28 = arith.addf %26, %27 : vector<8x256xf32>
      %cst_21 = arith.constant 0.000000e+00 : f32
      %29 = vector.broadcast %cst_21 : f32 to vector<8x256xf32>
      %30 = arith.maximumf %28, %29 : vector<8x256xf32>
      %31 = arith.truncf %30 : vector<8x256xf32> to vector<8x256xbf16>
      %cst_22 = arith.constant dense<0.000000e+00> : vector<8x128xf32>
      %32 = tpu.matmul %31, %17, %cst_22 {dimension_numbers = #tpu.dot_dimension_numbers<[1], [0], [0], [1], [0, 0, 1, 1], [], []>} : vector<8x256xbf16>, vector<256x128xbf16>, vector<8x128xf32> -> vector<8x128xf32>
      %33 = vector.broadcast %15 : vector<1x128xf32> to vector<8x128xf32>
      %34 = arith.addf %32, %33 : vector<8x128xf32>
      %c0_23 = arith.constant 0 : index
      %c0_24 = arith.constant 0 : index
      %35 = vector.load %arg6[%c0_23, %c0_24] : memref<8x256xf32, #tpu.memory_space<vmem>>, vector<8x128xf32>
      tpu.vector_store %arg6[%c0_23, %c0_24], %34 {strides = array<i32>} : memref<8x256xf32, #tpu.memory_space<vmem>>, vector<8x128xf32>,
      %c0_25 = arith.constant 0 : index
      %c128_26 = arith.constant 128 : index
      %36 = vector.load %arg6[%c0_25, %c128_26] : memref<8x256xf32, #tpu.memory_space<vmem>>, vector<8x128xf32>
      tpu.vector_store %arg6[%c0_25, %c128_26], %24 {strides = array<i32>} : memref<8x256xf32, #tpu.memory_space<vmem>>, vector<8x128xf32>,
    } else {
    }
    return
  }
  func.func @transform_0(%arg0: i32, %arg1: i32) -> (i32, i32, i32) {
    %c0_i32 = arith.constant 0 : i32
    %c0_i32_0 = arith.constant 0 : i32
    return %c0_i32, %arg0, %arg1 : i32, i32, i32
  }
  func.func @transform_1(%arg0: i32, %arg1: i32) -> (i32, i32) {
    %c0_i32 = arith.constant 0 : i32
    %c0_i32_0 = arith.constant 0 : i32
    return %arg1, %c0_i32 : i32, i32
  }
  func.func @transform_2(%arg0: i32, %arg1: i32) -> (i32, i32) {
    %c0_i32 = arith.constant 0 : i32
    %c0_i32_0 = arith.constant 0 : i32
    %c0_i32_1 = arith.constant 0 : i32
    return %c0_i32, %c0_i32_0 : i32, i32
  }
  func.func @transform_3(%arg0: i32, %arg1: i32) -> (i32, i32) {
    %c0_i32 = arith.constant 0 : i32
    %c0_i32_0 = arith.constant 0 : i32
    %c0_i32_1 = arith.constant 0 : i32
    return %c0_i32, %c0_i32_0 : i32, i32
  }
  func.func @transform_4(%arg0: i32, %arg1: i32) -> (i32, i32) {
    %c0_i32 = arith.constant 0 : i32
    %c0_i32_0 = arith.constant 0 : i32
    return %arg0, %c0_i32 : i32, i32
  }
}

</mosaic_0001>

<bundles_post_ra>
// kernel: siamese_forward.1
= control target key start
LH: loop header
LB: loop body
LE: loop exit
PB: predicated region body
PF: predicated region fallthrough
CT: control target
= control target key end

     0   :  { %v711_v31 = vmov 0   ;;  %s902_s1 = inlined_call_operand.vmem [shape: bf16[256,128], index: 1, kind: input, shape index: {}]   ;;  %s903_s0 = inlined_call_operand.vmem [shape: bf16[2,8,256], index: 0, kind: input, shape index: {}]   ;;  %s904_s2 = inlined_call_operand.vmem [shape: bf16[384,256], index: 2, kind: input, shape index: {}]   ;;  %s905_s3 = inlined_call_operand.vmem [shape: f32[8,256], index: 3, kind: input, shape index: {}]   ;;  %s906_s4 = inlined_call_operand.vmem [shape: f32[8,256], index: 4, kind: output, shape index: {}]  }
   0x1   :  { %v648_v0 = vld [vmem:[%s902_s1 + $0x40] sm:$0xff]   ;;  %v650_v2 = vld [vmem:[%s902_s1 + $0x48] sm:$0xff]   ;;  %v652_v4 = vld [vmem:[%s902_s1 + $0x50] sm:$0xff]   ;;  %397 = vmatprep.mubr.bf16.mxu1 %v711_v31 }
   0x2   :  { %v649_v1 = vld [vmem:[%s902_s1] sm:$0xff]   ;;  %603 = vmatprep.subr.bf16.mxu0 %v648_v0  ;;  %v651_v3 = vld [vmem:[%s902_s1 + $0x8] sm:$0xff]   ;;  %v653_v5 = vld [vmem:[%s902_s1 + $0x10] sm:$0xff]   ;;  %v275_v0 = vlaneseq }
   0x3   :  { %604 = vmatpush3.bf16.msra.mxu0 %v649_v1  ;;  %v654_v6 = vld [vmem:[%s902_s1 + $0x58] sm:$0xff]   ;;  %v656_v8 = vld [vmem:[%s902_s1 + $0x60] sm:$0xff]   ;;  %v658_v10 = vld [vmem:[%s902_s1 + $0x68] sm:$0xff]  }
   0x4   :  { %605 = vmatprep.subr.bf16.mxu0 %v650_v2  ;;  %v655_v7 = vld [vmem:[%s902_s1 + $0x18] sm:$0xff]   ;;  %v657_v9 = vld [vmem:[%s902_s1 + $0x20] sm:$0xff]   ;;  %v659_v11 = vld [vmem:[%s902_s1 + $0x28] sm:$0xff]   ;;  %v276_v1 = vshrl.u32 %v275_v0, 7 }
   0x5   :  { %v666_v12 = vld [vmem:[%s903_s0 + $0x4] ss:$8 sps:$4 sm:$0xff]   ;;  %v660_v13 = vld [vmem:[%s902_s1 + $0x70] sm:$0xff]   ;;  %v669_v15 = vld [vmem:[%s904_s2] ss:$8 sps:$4 sm:$0xff]  }
   0x6   :  { %v667_v14 = vld [vmem:[%s904_s2 + $0x4] ss:$8 sps:$4 sm:$0xff]   ;;  %198 = vmatprep.mubr.bf16.mxu0 %v666_v12  ;;  %v670_v16 = vld [vmem:[%s904_s2 + $0x14] ss:$8 sps:$4 sm:$0xff]   ;;  %v672_v17 = vld [vmem:[%s904_s2 + $0x10] ss:$8 sps:$4 sm:$0xff]  }
   0x7   :  { %606 = vmatpush3.bf16.msra.mxu0 %v651_v3  ;;  %365 = vmatprep.subr.bf16.mxu1 %v667_v14  ;;  %v673_v18 = vld [vmem:[%s904_s2 + $0x24] ss:$8 sps:$4 sm:$0xff]   ;;  %v661_v19 = vld [vmem:[%s902_s1 + $0x30] sm:$0xff]   ;;  %v662_v20 = vld [vmem:[%s902_s1 + $0x78] sm:$0xff]   ;;  %v277_v2 = vsub.s32 0, %v276_v1 }
   0x8   :  { %607 = vmatprep.subr.bf16.mxu0 %v652_v4  ;;  %366 = vmatpush1.bf16.msra.mxu1 %v669_v15  ;;  %v663_v21 = vld [vmem:[%s902_s1 + $0x38] sm:$0xff]   ;;  %v664_v22 = vld [vmem:[%s903_s0] ss:$8 sps:$4 sm:$0xff]   ;;  %v679_v26 = vld [vmem:[%s904_s2 + $0x44] ss:$8 sps:$4 sm:$0xff]   ;;  %v281_v4 = vsub.s32 1, %v276_v1 }
   0x9   :  { %367 = vmatprep.subr.bf16.mxu1 %v670_v16  ;;  %v675_v23 = vld [vmem:[%s904_s2 + $0x20] ss:$8 sps:$4 sm:$0xff]   ;;  %v676_v24 = vld [vmem:[%s904_s2 + $0x34] ss:$8 sps:$4 sm:$0xff]   ;;  %v678_v25 = vld [vmem:[%s904_s2 + $0x30] ss:$8 sps:$4 sm:$0xff]  }
   0xa   :  { %v681_v27 = vld [vmem:[%s904_s2 + $0x40] ss:$8 sps:$4 sm:$0xff]   ;;  %v682_v28 = vld [vmem:[%s904_s2 + $0x54] ss:$8 sps:$4 sm:$0xff]   ;;  %v684_v29 = vld [vmem:[%s904_s2 + $0x50] ss:$8 sps:$4 sm:$0xff]  }
   0xb   :  { %608 = vmatpush3.bf16.msra.mxu0 %v653_v5  ;;  %v685_v30 = vld [vmem:[%s904_s2 + $0x64] ss:$8 sps:$4 sm:$0xff]   ;;  %v687_v32 = vld [vmem:[%s904_s2 + $0x60] ss:$8 sps:$4 sm:$0xff]   ;;  %v688_v33 = vld [vmem:[%s904_s2 + $0x74] ss:$8 sps:$4 sm:$0xff]  }
   0xc   :  { %609 = vmatprep.subr.bf16.mxu0 %v654_v6  ;;  %368 = vmatpush1.bf16.msra.mxu1 %v672_v17  ;;  %v690_v34 = vld [vmem:[%s904_s2 + $0x70] ss:$8 sps:$4 sm:$0xff]   ;;  %v691_v35 = vld [vmem:[%s904_s2 + $0x100] ss:$8 sps:$4 sm:$0xff]  }
   0xd   :  { %369 = vmatprep.subr.bf16.mxu1 %v673_v18  ;;  %v692_v36 = vld [vmem:[%s904_s2 + $0x80] ss:$8 sps:$4 sm:$0xff]   ;;  %v693_v37 = vld [vmem:[%s904_s2 + $0x110] ss:$8 sps:$4 sm:$0xff]  }
   0xe   :  { %v694_v38 = vld [vmem:[%s904_s2 + $0x90] ss:$8 sps:$4 sm:$0xff]   ;;  %v695_v39 = vld [vmem:[%s904_s2 + $0x120] ss:$8 sps:$4 sm:$0xff]  }
   0xf   :  { %610 = vmatpush3.bf16.msra.mxu0 %v655_v7  ;;  %v696_v40 = vld [vmem:[%s904_s2 + $0xa0] ss:$8 sps:$4 sm:$0xff]   ;;  %v697_v41 = vld [vmem:[%s904_s2 + $0x130] ss:$8 sps:$4 sm:$0xff]  }
  0x10   :  { %611 = vmatprep.subr.bf16.mxu0 %v656_v8  ;;  %370 = vmatpush1.bf16.msra.mxu1 %v675_v23  ;;  %v698_v42 = vld [vmem:[%s904_s2 + $0xb0] ss:$8 sps:$4 sm:$0xff]   ;;  %v699_v43 = vld [vmem:[%s904_s2 + $0x140] ss:$8 sps:$4 sm:$0xff]  }
  0x11   :  { %371 = vmatprep.subr.bf16.mxu1 %v676_v24  ;;  %v700_v44 = vld [vmem:[%s904_s2 + $0xc0] ss:$8 sps:$4 sm:$0xff]   ;;  %v701_v45 = vld [vmem:[%s904_s2 + $0x150] ss:$8 sps:$4 sm:$0xff]  }
  0x12   :  { %v702_v46 = vld [vmem:[%s904_s2 + $0xd0] ss:$8 sps:$4 sm:$0xff]   ;;  %v214_v49 = vld [vmem:[%s905_s3] ss:$0 sm:$0xff]  ;;  %v217_v18 = vld [vmem:[%s905_s3 + $0x2] ss:$0 sm:$0xff] }
  0x13   :  { %612 = vmatpush3.bf16.msra.mxu0 %v657_v9  ;;  %v703_v60 = vld [vmem:[%s904_s2 + $0x160] ss:$8 sps:$4 sm:$0xff]   ;;  %v705_v62 = vld [vmem:[%s904_s2 + $0x170] ss:$8 sps:$4 sm:$0xff]  }
  0x14   :  { %613 = vmatprep.subr.bf16.mxu0 %v658_v10  ;;  %372 = vmatpush1.bf16.msra.mxu1 %v678_v25  ;;  %v704_v61 = vld [vmem:[%s904_s2 + $0xe0] ss:$8 sps:$4 sm:$0xff]   ;;  %v706_v63 = vld [vmem:[%s904_s2 + $0xf0] ss:$8 sps:$4 sm:$0xff]  }
  0x15   :  { %373 = vmatprep.subr.bf16.mxu1 %v679_v26  ;;  %v570_v3 = vld [vmem:[%s905_s3 + $0x1] ss:$8 sm:$0x3] }
  0x16   :  { %v278_v5 = vrot.slane %v570_v3, %v277_v2  ;;  %v282_v6 = vrot.slane %v570_v3, %v281_v4 }
  0x17   :  { %614 = vmatpush3.bf16.msra.mxu0 %v659_v11 }
  0x18   :  { %615 = vmatprep.subr.bf16.mxu0 %v660_v13  ;;  %374 = vmatpush1.bf16.msra.mxu1 %v681_v27 }
  0x19   :  { %375 = vmatprep.subr.bf16.mxu1 %v682_v28 }
  0x1b   :  { %616 = vmatpush3.bf16.msra.mxu0 %v661_v19 }
  0x1c   :  { %617 = vmatprep.subr.bf16.mxu0 %v662_v20  ;;  %376 = vmatpush1.bf16.msra.mxu1 %v684_v29 }
  0x1d   :  { %377 = vmatprep.subr.bf16.mxu1 %v685_v30 }
  0x1f   :  { %618 = vmatpush3.bf16.msra.mxu0 %v663_v21 }
  0x20   :  { %378 = vmatpush1.bf16.msra.mxu1 %v687_v32  ;;  %625 = vmatprep.subr.bf16.mxu0 %v691_v35 }
  0x21   :  { %379 = vmatprep.subr.bf16.mxu1 %v688_v33 }
  0x22   :  { %199 = vmatmul.mubr.bf16.vlgmr.msra.gmra.mrb[0].mxu0 %v664_v22 }
  0x23   :  { %626 = vmatpush3.bf16.msra.mxu0 %v692_v36 }
  0x24   :  { %380 = vmatpush1.bf16.msra.mxu1 %v690_v34  ;;  %627 = vmatprep.subr.bf16.mxu0 %v693_v37 }
  0x27   :  { %628 = vmatpush3.bf16.msra.mxu0 %v694_v38 }
  0x28   :  { %629 = vmatprep.subr.bf16.mxu0 %v695_v39 }
  0x2b   :  { %630 = vmatpush3.bf16.msra.mxu0 %v696_v40 }
  0x2c   :  { %631 = vmatprep.subr.bf16.mxu0 %v697_v41 }
  0x2f   :  { %632 = vmatpush3.bf16.msra.mxu0 %v698_v42 }
  0x30   :  { %633 = vmatprep.subr.bf16.mxu0 %v699_v43 }
  0x33   :  { %634 = vmatpush3.bf16.msra.mxu0 %v700_v44 }
  0x34   :  { %635 = vmatprep.subr.bf16.mxu0 %v701_v45 }
  0x37   :  { %636 = vmatpush3.bf16.msra.mxu0 %v702_v46 }
  0x38   :  { %637 = vmatprep.subr.bf16.mxu0 %v703_v60 }
  0x3b   :  { %638 = vmatpush3.bf16.msra.mxu0 %v704_v61 }
  0x3c   :  { %639 = vmatprep.subr.bf16.mxu0 %v705_v62 }
  0x3f   :  { %640 = vmatpush3.bf16.msra.mxu0 %v706_v63 }
  0xf5   :  { %v619_v47 = vpop.f32.mrb[0].mxu0 }
  0xf6   :  { %v620_v48 = vpop.f32.mrb[1].mxu0 }
  0xf7   :  { %v621_v50 = vadd.f32 %v620_v48, %v619_v47  ;;  %v622_v51 = vpop.f32.mrb[2].mxu0 }
  0xf8   :  { %v623_v52 = vpop.f32.mrb[3].mxu0 }
  0xf9   :  { %v268_v53 = vadd.f32 %v621_v50, %v214_v49  ;;  %v624_v54 = vadd.f32 %v623_v52, %v622_v51 }
  0xfb   :  { %v269_v55 = vadd.f32 %v624_v54, %v214_v49  ;;  %707 = vtanh.f32 %v268_v53 }
  0xfd   :  { %709 = vtanh.f32 %v269_v55 }
 0x105   :  { %v708_v56 = vpop.eup %707 }
 0x107   :  { %v710_v57 = vpop.eup %709 }
 0x108   :  { %v272_v58 = vmul.f32 %v710_v57, %v708_v56 }
 0x10a   :  { %v273_v59 = vpack.c.bf16 %v272_v58, %v272_v58  ;;  %547 = vst [vmem:[%s906_s4 + $0x8] sm:$0xff] %v272_v58 }
 0x10c   :  { %398 = vmatmul.mubr.bf16.vlgmr.msra.gmra.mrb[0].mxu1 %v273_v59 }
 0x1df   :  { %v399_v7 = vpop.f32.mrb[0].mxu1 }
 0x1e0   :  { %v400_v8 = vadd.f32 %v399_v7, %v278_v5  ;;  %v401_v9 = vpop.f32.mrb[1].mxu1 }
 0x1e1   :  { %v402_v10 = vadd.f32 %v401_v9, %v282_v6  ;;  %v403_v11 = vpop.f32.mrb[2].mxu1 }
 0x1e2   :  { %v406_v12 = vmax.f32 %v400_v8, 0.0  ;;  %v404_v13 = vpop.f32.mrb[3].mxu1 }
 0x1e3   :  { %v407_v14 = vmax.f32 %v402_v10, 0.0 }
 0x1e4   :  { %v408_v16 = vpack.c.bf16 %v406_v12, %v406_v12 }
 0x1e5   :  { %v409_v15 = vpack.c.bf16 %v407_v14, %v407_v14 }
 0x1e7   :  { %538 = vmatprep.mubr.bf16.mxu0 %v409_v15 }
 0x1e8   :  { %539 = vmatmul.mubr.bf16.vlgmr.msra.gmra.mrb[4].mxu0 %v408_v16 }
 0x2bb   :  { %v641_v17 = vpop.f32.mrb[4].mxu0 }
 0x2bc   :  { %v642_v19 = vpop.f32.mrb[5].mxu0 }
 0x2bd   :  { %v643_v20 = vadd.f32 %v642_v19, %v641_v17  ;;  %v644_v21 = vpop.f32.mrb[6].mxu0 }
 0x2be   :  { %v645_v22 = vpop.f32.mrb[7].mxu0 }
 0x2bf   :  { %v541_v23 = vadd.f32 %v643_v20, %v217_v18 }
 0x2c1   :  { %546 = vst [vmem:[%s906_s4] sm:$0xff] %v541_v23 }

</bundles_post_ra>
